<compile_context>
chip_gen: v6e
topology: v6e:2x2x1
jax: 0.10.0
libtpu: 0.0.40
codegen_flags: <defaults>
</compile_context>

<pallas_src>
import functools

import jax
import jax.numpy as jnp
import numpy as np
from jax import lax
from jax.experimental import pallas as pl
from jax.experimental.pallas import tpu as pltpu


def _int32_threshold(keep_prob: float) -> int:
    """Signed int32 threshold t with P(bits_i32 < t) == keep_prob for bits
    uniform over all 2^32 patterns (uint32 bits bitcast to int32)."""
    t = int(round(keep_prob * 2.0 ** 32))
    t = max(0, min(t, 2 ** 32 - 1))
    return t - 2 ** 31


def _fused_dropout_kernel(s_ref, bs_ref, v_ref, bv_ref, os_ref, ov_ref, *,
                          thr, inv_keep):
    # Scalar channels: elementwise inverted dropout.
    s = s_ref[...]
    os_ref[...] = jnp.where(bs_ref[...] < thr, s * inv_keep, 0.0).astype(os_ref.dtype)
    # Vector channels: V arrives flattened to [blk, 3*nv]; the mask bits were
    # repeated 3x per channel so whole 3-vectors share one Bernoulli draw.
    v = v_ref[...]
    ov_ref[...] = jnp.where(bv_ref[...] < thr, v * inv_keep, 0.0).astype(ov_ref.dtype)


def _s_only_dropout_kernel(s_ref, bs_ref, os_ref, *, thr, inv_keep):
    s = s_ref[...]
    os_ref[...] = jnp.where(bs_ref[...] < thr, s * inv_keep, 0.0).astype(os_ref.dtype)


def _pick_block_rows(n, requested=None):
    if requested is not None:
        return int(requested)
    # Full array if small (allowed by the (8,128) rule when it equals the full
    # dim); otherwise 512 rows (multiple of 8, ~85% of HBM roofline measured).
    return n if n <= 512 else 512


def _row_spec(blk, width):
    return pl.BlockSpec((blk, width), lambda i: (i, 0))


def dropout_forward(s, v, drop_rate, *, key, training=True, block_rows=None):
    """Forward pass of GVP `Dropout` on the tuple (s, V). `v` may be None."""
    if not training or drop_rate == 0.0:
        return s, v

    keep = 1.0 - float(drop_rate)
    inv_keep = 1.0 / keep
    thr = _int32_threshold(keep)

    n, ns = s.shape
    blk = _pick_block_rows(n, block_rows)
    grid = (pl.cdiv(n, blk),)
    cparams = pltpu.CompilerParams(
        dimension_semantics=("parallel",),        # shard grid across TCs
        vmem_limit_bytes=32 * 1024 * 1024,        # safe on v5e/v6e/v7x
    )

    ks, kv = jax.random.split(key)
    bits_s = lax.bitcast_convert_type(
        jax.random.bits(ks, (n, ns), dtype=jnp.uint32), jnp.int32)

    if v is None:
        s_out = pl.pallas_call(
            functools.partial(_s_only_dropout_kernel, thr=thr, inv_keep=inv_keep),
            out_shape=jax.ShapeDtypeStruct((n, ns), s.dtype),
            grid=grid,
            in_specs=[_row_spec(blk, ns), _row_spec(blk, ns)],
            out_specs=_row_spec(blk, ns),
            compiler_params=cparams,
        )(s, bits_s)
        return s_out, None

    nv = v.shape[1]
    nv3 = nv * 3
    v_flat = v.reshape(n, nv3)  # lane-dense layout: big contiguous axis last
    # One Bernoulli draw per vector channel, repeated over the 3 components.
    bits_v = lax.bitcast_convert_type(
        jax.random.bits(kv, (n, nv), dtype=jnp.uint32), jnp.int32)
    bits_v3 = jnp.repeat(bits_v, 3, axis=-1)  # matches reshape(n, nv*3) order

    s_out, v_out_flat = pl.pallas_call(
        functools.partial(_fused_dropout_kernel, thr=thr, inv_keep=inv_keep),
        out_shape=(jax.ShapeDtypeStruct((n, ns), s.dtype),
                   jax.ShapeDtypeStruct((n, nv3), v.dtype)),
        grid=grid,
        in_specs=[_row_spec(blk, ns), _row_spec(blk, ns),
                  _row_spec(blk, nv3), _row_spec(blk, nv3)],
        out_specs=(_row_spec(blk, ns), _row_spec(blk, nv3)),
        compiler_params=cparams,
    )(s, bits_s, v_flat, bits_v3)

    return s_out, v_out_flat.reshape(n, nv, 3)


if __name__ == "__main__":
    key = jax.random.PRNGKey(0)
    k_s, k_v, k_drop = jax.random.split(key, 3)

    N, ns, nv = 16, 32, 4            # nodes, scalar channels, vector channels
    s = jax.random.normal(k_s, (N, ns), dtype=jnp.float32)
    v = jax.random.normal(k_v, (N, nv, 3), dtype=jnp.float32)
    drop_rate = 0.5

    # block_rows=8 -> grid of 2 blocks, exercises the tiled/parallel path.
    s_out, v_out = dropout_forward(s, v, drop_rate, key=k_drop,
                                   training=True, block_rows=8)
    jax.block_until_ready((s_out, v_out))

    # --- lightweight semantic checks -------------------------------------
    s_np, v_np = np.asarray(s), np.asarray(v)
    so_np, vo_np = np.asarray(s_out), np.asarray(v_out)
    keep = 1.0 - drop_rate

    # scalar dropout: each element is either 0 or s / keep
    ok_s = np.all(
        np.isclose(so_np, 0.0, atol=1e-6)
        | np.isclose(so_np, s_np / keep, rtol=1e-5, atol=1e-6)
    )
    # vector dropout: each 3-vector is dropped/kept as a whole
    kept = ~np.all(np.isclose(vo_np, 0.0, atol=1e-6), axis=-1)  # [N, nv]
    ok_v = np.all(
        np.isclose(vo_np[kept], v_np[kept] / keep, rtol=1e-5, atol=1e-6)
    ) and np.all(np.isclose(vo_np[~kept], 0.0, atol=1e-6))

    # v=None path: scalar-only dropout
    s_only, v_none = dropout_forward(s, None, drop_rate, key=k_drop,
                                     training=True, block_rows=8)
    jax.block_until_ready(s_only)
    so2_np = np.asarray(s_only)
    ok_s_only = v_none is None and np.all(
        np.isclose(so2_np, 0.0, atol=1e-6)
        | np.isclose(so2_np, s_np / keep, rtol=1e-5, atol=1e-6)
    )

    # eval mode is identity
    s_eval, v_eval = dropout_forward(s, v, drop_rate, key=k_drop, training=False)
    ok_eval = np.array_equal(np.asarray(s_eval), s_np) and np.array_equal(
        np.asarray(v_eval), v_np
    )

    assert ok_s and ok_v and ok_s_only and ok_eval
    print("KERNEL_OK")
</pallas_src>

<mosaic_0001>
module attributes {stable_mosaic.version = 11 : i64} {
  func.func @_fused_dropout_kernel(%arg0: i32, %arg1: memref<8x32xf32, #tpu.memory_space<vmem>>, %arg2: memref<8x32xi32, #tpu.memory_space<vmem>>, %arg3: memref<8x12xf32, #tpu.memory_space<vmem>>, %arg4: memref<8x12xi32, #tpu.memory_space<vmem>>, %arg5: memref<8x32xf32, #tpu.memory_space<vmem>>, %arg6: memref<8x12xf32, #tpu.memory_space<vmem>>) attributes {dimension_semantics = [#tpu.dimension_semantics<parallel>], iteration_bounds = array<i64: 2>, scalar_prefetch = 0 : i64, scratch_operands = 0 : i64, tpu.core_type = #tpu.core_type<tc>, window_params = [{transform_indices = @transform_0, window_bounds = array<i64: 8, 32>}, {transform_indices = @transform_1, window_bounds = array<i64: 8, 32>}, {transform_indices = @transform_2, window_bounds = array<i64: 8, 12>}, {transform_indices = @transform_3, window_bounds = array<i64: 8, 12>}, {transform_indices = @transform_4, window_bounds = array<i64: 8, 32>}, {transform_indices = @transform_5, window_bounds = array<i64: 8, 12>}]} {
    %c0 = arith.constant 0 : index
    %c0_0 = arith.constant 0 : index
    %0 = vector.load %arg1[%c0, %c0_0] : memref<8x32xf32, #tpu.memory_space<vmem>>, vector<8x32xf32>
    %c0_1 = arith.constant 0 : index
    %c0_2 = arith.constant 0 : index
    %1 = vector.load %arg2[%c0_1, %c0_2] : memref<8x32xi32, #tpu.memory_space<vmem>>, vector<8x32xi32>
    %c0_i32 = arith.constant 0 : i32
    %2 = vector.broadcast %c0_i32 : i32 to vector<8x32xi32>
    %3 = arith.cmpi slt, %1, %2 : vector<8x32xi32>
    %cst = arith.constant 2.000000e+00 : f32
    %4 = vector.broadcast %cst : f32 to vector<8x32xf32>
    %5 = arith.mulf %0, %4 : vector<8x32xf32>
    %cst_3 = arith.constant 0.000000e+00 : f32
    %6 = vector.broadcast %cst_3 : f32 to vector<8x32xf32>
    %7 = arith.select %3, %5, %6 : vector<8x32xi1>, vector<8x32xf32>
    %c0_4 = arith.constant 0 : index
    %c0_5 = arith.constant 0 : index
    %8 = vector.load %arg5[%c0_4, %c0_5] : memref<8x32xf32, #tpu.memory_space<vmem>>, vector<8x32xf32>
    tpu.vector_store %arg5[%c0_4, %c0_5], %7 {strides = array<i32>} : memref<8x32xf32, #tpu.memory_space<vmem>>, vector<8x32xf32>,
    %c0_6 = arith.constant 0 : index
    %c0_7 = arith.constant 0 : index
    %9 = vector.load %arg3[%c0_6, %c0_7] : memref<8x12xf32, #tpu.memory_space<vmem>>, vector<8x12xf32>
    %c0_8 = arith.constant 0 : index
    %c0_9 = arith.constant 0 : index
    %10 = vector.load %arg4[%c0_8, %c0_9] : memref<8x12xi32, #tpu.memory_space<vmem>>, vector<8x12xi32>
    %c0_i32_10 = arith.constant 0 : i32
    %11 = vector.broadcast %c0_i32_10 : i32 to vector<8x12xi32>
    %12 = arith.cmpi slt, %10, %11 : vector<8x12xi32>
    %cst_11 = arith.constant 2.000000e+00 : f32
    %13 = vector.broadcast %cst_11 : f32 to vector<8x12xf32>
    %14 = arith.mulf %9, %13 : vector<8x12xf32>
    %cst_12 = arith.constant 0.000000e+00 : f32
    %15 = vector.broadcast %cst_12 : f32 to vector<8x12xf32>
    %16 = arith.select %12, %14, %15 : vector<8x12xi1>, vector<8x12xf32>
    %c0_13 = arith.constant 0 : index
    %c0_14 = arith.constant 0 : index
    %17 = vector.load %arg6[%c0_13, %c0_14] : memref<8x12xf32, #tpu.memory_space<vmem>>, vector<8x12xf32>
    tpu.vector_store %arg6[%c0_13, %c0_14], %16 {strides = array<i32>} : memref<8x12xf32, #tpu.memory_space<vmem>>, vector<8x12xf32>,
    return
  }
  func.func @transform_0(%arg0: i32) -> (i32, i32) {
    %c0_i32 = arith.constant 0 : i32
    %c0_i32_0 = arith.constant 0 : i32
    return %arg0, %c0_i32 : i32, i32
  }
  func.func @transform_1(%arg0: i32) -> (i32, i32) {
    %c0_i32 = arith.constant 0 : i32
    %c0_i32_0 = arith.constant 0 : i32
    return %arg0, %c0_i32 : i32, i32
  }
  func.func @transform_2(%arg0: i32) -> (i32, i32) {
    %c0_i32 = arith.constant 0 : i32
    %c0_i32_0 = arith.constant 0 : i32
    return %arg0, %c0_i32 : i32, i32
  }
  func.func @transform_3(%arg0: i32) -> (i32, i32) {
    %c0_i32 = arith.constant 0 : i32
    %c0_i32_0 = arith.constant 0 : i32
    return %arg0, %c0_i32 : i32, i32
  }
  func.func @transform_4(%arg0: i32) -> (i32, i32) {
    %c0_i32 = arith.constant 0 : i32
    %c0_i32_0 = arith.constant 0 : i32
    return %arg0, %c0_i32 : i32, i32
  }
  func.func @transform_5(%arg0: i32) -> (i32, i32) {
    %c0_i32 = arith.constant 0 : i32
    %c0_i32_0 = arith.constant 0 : i32
    return %arg0, %c0_i32 : i32, i32
  }
}

</mosaic_0001>

<bundles_post_ra>
// kernel: tpu_custom_call.1
= control target key start
LH: loop header
LB: loop body
LE: loop exit
PB: predicated region body
PF: predicated region fallthrough
CT: control target
= control target key end

     0   :  { %s1193_s0 = inlined_call_operand.hbm [shape: f32[16,32], index: 0, kind: input, shape index: {}]   ;;  %s1194_s1 = inlined_call_operand.hbm [shape: s32[16,32], index: 1, kind: input, shape index: {}]   ;;  %s1195_s2 = inlined_call_operand.hbm [shape: f32[16,12], index: 2, kind: input, shape index: {}]   ;;  %s1196_s3 = inlined_call_operand.hbm [shape: s32[16,12], index: 3, kind: input, shape index: {}]   ;;  %s1197_s4 = inlined_call_operand.hbm [shape: f32[16,32], index: 4, kind: output, shape index: {0}]   ;;  %s1198_s5 = inlined_call_operand.hbm [shape: f32[16,12], index: 5, kind: output, shape index: {1}]  }
   0x1   :  { %1205 = sst [smem:[#allocation22_spill]] %s1193_s0 }
   0x2   :  { %1206 = sst [smem:[#allocation23_spill]] %s1194_s1 }
   0x3   :  { %11 = vsyncpa [#allocation3], 0 }
   0x4   :  { %13 = vsyncpa [#allocation3 + $0x1], 0 }
   0x5   :  { %14 = vsyncpa [#allocation6], 0 }
   0x6   :  { %16 = vsyncpa [#allocation6 + $0x1], 0 }
   0x7   :  { %17 = vsyncpa [#allocation9], 0 }
   0x8   :  { %19 = vsyncpa [#allocation9 + $0x1], 0 }
   0x9   :  { %20 = vsyncpa [#allocation4], 0 }
   0xa   :  { %22 = vsyncpa [#allocation4 + $0x1], 0 }
   0xb   :  { %23 = vsyncpa [#allocation12], 0 }
   0xc   :  { %25 = vsyncpa [#allocation12 + $0x1], 0  ;;  %s915_s18 = smov 0   ;;  %s917_s19 = smov 0  }
   0xd   :  { %s919_s20 = smov 0   ;;  %s921_s21 = smov 0  }
   0xe LB: > { %1207 = sst [smem:[#allocation18_spill]] %s873_s20  ;;  %s936_s22 = sadd.s32 4294967295, %s877_s21   ;;  %s877_s21 = sphi %s921_s21, %s1226_s21   ;;  %s873_s20 = sphi %s919_s20, %s1228_s20   ;;  %s869_s19 = sphi %s917_s19, %s1230_s19   ;;  %s865_s18 = sphi %s915_s18, %s1229_s18  }
   0xf   : > { %1208 = sst [smem:[#allocation19_spill]] %s877_s21  ;;  %s573_s23 = sadd.s32 4294967294, %s877_s21  }
  0x10   : > { %s940_s24 = sadd.s32 1, %s877_s21   ;;  %s38_s25 = sadd.s32 1, %s873_s20 }
  0x11   : > { %1209 = sst [smem:[#allocation20_spill]] %s940_s24  ;;  %s35_s26 = ssub.s32 %s877_s21, %s940_s24 }
  0x12   : > { %p45_p0 = scmp.ne.s32.totalorder %s873_s20, %s869_s19  ;;  %p36_p1 = scmp.eq.s32.totalorder %s35_s26, 0 }
  0x13   : > { %p46_p2 = scmp.eq.s32.totalorder %s877_s21, 0  ;;  %p51_p3 = scmp.ne.s32.totalorder %s869_s19, %s865_s18 }
  0x14   : > { %p52_p4 = scmp.eq.s32.totalorder %s936_s22, 0  ;;  %p153_p7 = scmp.eq.s32.totalorder %s936_s22, 1 }
  0x15   : > { %s952_s27 = scalar_select %p36_p1, %s873_s20, %s38_s25  }
  0x16   : > { %p47_p5 = por %p46_p2, %p45_p0  ;;  %p954_p6 = por %p52_p4, %p51_p3 }
  0x17   : > { %1210 = sst [smem:[#allocation21_spill]] %s952_s27  ;;  %p159_p8 = scmp.eq.s32.totalorder %s573_s23, 1 }
  0x18   : > { %s1211_s28 = scalar_select %p954_p6, 1, 0 }
  0x19   : > { %p629_p10 = scmp.lt.s32.totalorder %s877_s21, 2  ;;  %p961_p11 = por %p153_p7, %p45_p0 }
  0x1a   : > { %p965_p12 = por %p159_p8, %p51_p3  ;;  %s970_s6 = sand.u32 1, %s873_s20  }
  0x1b   : > { %s1212_s29 = scalar_select %p961_p11, 1, 0 }
  0x1c   : > { %s1213_s30 = scalar_select %p965_p12, 1, 0 }
  0x1d   : > { %s973_s7 = sshll.u32 %s877_s21, 7  ;;  %s976_s8 = sshll.u32 %s970_s6, 3 }
  0x1e   : > { %p978_p13 = pnand %p629_p10, %p47_p5  ;;  %s223_s10 = sand.u32 1, %s877_s21  }
  0x1f   : > { %s1215_s1 = sld [smem:[#allocation23_spill]]  ;;  %s227_s14 = scalar_lea.vmem [#allocation5], %s976_s8 }
  0x20   : > { %s234_s15 = sshll.u32 %s227_s14, 4  ;;  %s991_s16 = scalar_lea.sflag [#allocation6], %s223_s10  ;;  %s235_s15 = int_to_ptr.vmem [resolvable:$true] %s234_s15 }
  0x21   : > { %p997_p2 = pneg %p978_p13 }
  0x25   : > { %s987_s13 = scalar_lea.hbm %s1215_s1, %s973_s7  ;;  %s668_s11 = scalar_lea.hbm %s1215_s1, 256 }
  0x26   : > { %s663_s17 = scalar_lea.hbm %s987_s13, 128  ;;  %p669_p5 = scmp.lt.s32.totalorder %s987_s13, %s1215_s1 }
  0x27   : > { %p664_p1 = scmp.ne.s32.totalorder %s987_s13, %s663_s17  ;;  %p670_p7 = scmp.lt.s32.totalorder %s668_s11, %s663_s17 }
  0x29   : > { %p666_p3 = pnand %p997_p2, %p664_p1  ;;  %p671_p8 = por %p670_p7, %p669_p5 }
  0x2b   : > { %p667_p4 = pneg %p666_p3 }
  0x2d   : > { %p672_p10 = pnand %p671_p8, %p667_p4 }
  0x2f   : > { %675 = shalt.err (!%p672_p10)
}
  0x30   : > { %s676_s10 = scalar_lea.vmem %s235_s15, 128  ;;  %s879_s27 = smov [#allocation5]  }
  0x31   : > { %p677_p9 = scmp.ne.s32.totalorder %s235_s15, %s676_s10  ;;  %s681_s20 = sshll.u32 %s879_s27, 4  ;;  %s682_s20 = int_to_ptr.vmem [resolvable:$false] %s681_s20 }
  0x32   : > { %s683_s24 = scalar_lea.vmem %s682_s20, 256  ;;  %p684_p1 = scmp.lt.s32.totalorder %s235_s15, %s682_s20 }
  0x33   : > { %p679_p0 = pnand %p677_p9, %p997_p2  ;;  %p685_p3 = scmp.lt.s32.totalorder %s683_s24, %s676_s10 }
  0x35   : > { %p680_p12 = pneg %p679_p0  ;;  %p686_p11 = por %p685_p3, %p684_p1 }
  0x37   : > { %p687_p6 = pnand %p686_p11, %p680_p12 }
  0x39   : > { %690 = shalt.err (!%p687_p6)
}
  0x3a   : > { %615 = dma.hbm_to_vmem [thread:$0]  (!%p978_p13), %s987_s13, 128, %s235_s15, %s991_s16  }
  0x3b   : > { %p275_p9 = scmp.lt.s32.totalorder %s877_s21, 3  ;;  %s1217_s0 = sld [smem:[#allocation22_spill]] }
  0x3c   : > { %p1218_p0 = scmp.ge.s32.totalorder %s877_s21, 1  ;;  %s209_s25 = scalar_lea.vmem [#allocation2], %s976_s8 }
  0x3d   : > { %s216_s26 = sshll.u32 %s209_s25, 4  ;;  %s206_s11 = scalar_lea.sflag [#allocation3], %s970_s6  ;;  %s217_s26 = int_to_ptr.vmem [resolvable:$true] %s216_s26 }
  0x3e   : > { %p1025_p6 = pnand %p1218_p0, %p275_p9 }
  0x40   : > { %s1219_s24 = scalar_select %p1025_p6, 1, 0 }
  0x41   : > { %s1021_s20 = scalar_lea.hbm %s1217_s0, %s973_s7  ;;  %s696_s14 = scalar_lea.hbm %s1217_s0, 256 }
  0x42   : > { %s691_s12 = scalar_lea.hbm %s1021_s20, 128  ;;  %p697_p5 = scmp.lt.s32.totalorder %s1021_s20, %s1217_s0 }
  0x43   : > { %p692_p11 = scmp.ne.s32.totalorder %s1021_s20, %s691_s12  ;;  %p698_p7 = scmp.lt.s32.totalorder %s696_s14, %s691_s12 }
  0x45   : > { %p694_p12 = pnand %p692_p11, %p997_p2  ;;  %p699_p8 = por %p698_p7, %p697_p5 }
  0x47   : > { %p695_p4 = pneg %p694_p12 }
  0x49   : > { %p700_p10 = pnand %p699_p8, %p695_p4 }
  0x4b   : > { %703 = shalt.err (!%p700_p10)
}
  0x4c   : > { %s704_s17 = scalar_lea.vmem %s217_s26, 128  ;;  %s880_s25 = smov [#allocation2]  }
  0x4d   : > { %p705_p1 = scmp.ne.s32.totalorder %s217_s26, %s704_s17  ;;  %s709_s1 = sshll.u32 %s880_s25, 4  ;;  %s710_s1 = int_to_ptr.vmem [resolvable:$false] %s709_s1 }
  0x4e   : > { %s711_s21 = scalar_lea.vmem %s710_s1, 256  ;;  %p712_p0 = scmp.lt.s32.totalorder %s217_s26, %s710_s1 }
  0x4f   : > { %p707_p3 = pnand %p705_p1, %p997_p2  ;;  %p713_p11 = scmp.lt.s32.totalorder %s711_s21, %s704_s17 }
  0x51   : > { %p708_p9 = pneg %p707_p3  ;;  %p714_p12 = por %p713_p11, %p712_p0 }
  0x53   : > { %p715_p6 = pnand %p714_p12, %p708_p9 }
  0x55   : > { %718 = shalt.err (!%p715_p6)
}
  0x56   : > { %612 = dma.hbm_to_vmem [thread:$0]  (!%p978_p13), %s1021_s20, 128, %s217_s26, %s206_s11  }
  0x57   : > { %s250_s15 = scalar_lea.hbm %s1195_s2, %s973_s7  ;;  %s245_s14 = scalar_lea.vmem [#allocation7], %s976_s8 }
  0x58   : > { %s252_s10 = sshll.u32 %s245_s14, 4  ;;  %s719_s27 = scalar_lea.hbm %s250_s15, 128  ;;  %s253_s10 = int_to_ptr.vmem [resolvable:$true] %s252_s10 }
  0x59   : > { %p720_p4 = scmp.ne.s32.totalorder %s250_s15, %s719_s27  ;;  %s724_s17 = scalar_lea.hbm %s1195_s2, 256 }
  0x5a   : > { %p725_p6 = scmp.lt.s32.totalorder %s250_s15, %s1195_s2  ;;  %p726_p8 = scmp.lt.s32.totalorder %s724_s17, %s719_s27 }
  0x5b   : > { %p722_p5 = pnand %p720_p4, %p997_p2 }
  0x5c   : > { %p727_p10 = por %p726_p8, %p725_p6 }
  0x5d   : > { %p723_p7 = pneg %p722_p5 }
  0x5f   : > { %p728_p1 = pnand %p727_p10, %p723_p7 }
  0x61   : > { %731 = shalt.err (!%p728_p1)
}
  0x62   : > { %s732_s20 = scalar_lea.vmem %s253_s10, 128  ;;  %s881_s26 = smov [#allocation7]  }
  0x63   : > { %p733_p3 = scmp.ne.s32.totalorder %s253_s10, %s732_s20  ;;  %s737_s11 = sshll.u32 %s881_s26, 4  ;;  %s738_s11 = int_to_ptr.vmem [resolvable:$false] %s737_s11 }
  0x64   : > { %s739_s12 = scalar_lea.vmem %s738_s11, 256  ;;  %p740_p11 = scmp.lt.s32.totalorder %s253_s10, %s738_s11 }
  0x65   : > { %p735_p9 = pnand %p733_p3, %p997_p2  ;;  %p741_p12 = scmp.lt.s32.totalorder %s739_s12, %s732_s20 }
  0x67   : > { %p736_p0 = pneg %p735_p9  ;;  %p742_p4 = por %p741_p12, %p740_p11 }
  0x69   : > { %p743_p5 = pnand %p742_p4, %p736_p0 }
  0x6b   : > { %746 = shalt.err (!%p743_p5)
}
  0x6c   : > { %618 = dma.hbm_to_vmem [thread:$0]  (!%p978_p13), %s250_s15, 128, %s253_s10, %s991_s16  }
  0x6d   : > { %s1069_s14 = scalar_lea.hbm %s1196_s3, %s973_s7  ;;  %s263_s27 = scalar_lea.vmem [#allocation8], %s976_s8 }
  0x6e   : > { %s270_s1 = sshll.u32 %s263_s27, 4  ;;  %s260_s21 = scalar_lea.sflag [#allocation9], %s970_s6  ;;  %s271_s1 = int_to_ptr.vmem [resolvable:$true] %s270_s1 }
  0x6f   : > { %s747_s17 = scalar_lea.hbm %s1069_s14, 128  ;;  %s752_s16 = scalar_lea.hbm %s1196_s3, 256 }
  0x70   : > { %p748_p7 = scmp.ne.s32.totalorder %s1069_s14, %s747_s17  ;;  %p753_p10 = scmp.lt.s32.totalorder %s1069_s14, %s1196_s3 }
  0x71   : > { %p754_p1 = scmp.lt.s32.totalorder %s752_s16, %s747_s17 }
  0x72   : > { %p750_p6 = pnand %p748_p7, %p997_p2 }
  0x73   : > { %p755_p3 = por %p754_p1, %p753_p10 }
  0x74   : > { %p751_p8 = pneg %p750_p6 }
  0x76   : > { %p756_p9 = pnand %p755_p3, %p751_p8 }
  0x78   : > { %759 = shalt.err (!%p756_p9)
}
  0x79   : > { %s760_s7 = scalar_lea.vmem %s271_s1, 128  ;;  %s882_s6 = smov [#allocation8]  }
  0x7a   : > { %p761_p0 = scmp.ne.s32.totalorder %s271_s1, %s760_s7  ;;  %s765_s8 = sshll.u32 %s882_s6, 4  ;;  %s766_s8 = int_to_ptr.vmem [resolvable:$false] %s765_s8 }
  0x7b   : > { %s767_s26 = scalar_lea.vmem %s766_s8, 256  ;;  %p768_p4 = scmp.lt.s32.totalorder %s271_s1, %s766_s8 }
  0x7c   : > { %p763_p11 = pnand %p761_p0, %p997_p2  ;;  %p769_p5 = scmp.lt.s32.totalorder %s767_s26, %s760_s7 }
  0x7e   : > { %p764_p12 = pneg %p763_p11  ;;  %p770_p7 = por %p769_p5, %p768_p4 }
  0x80   : > { %p771_p6 = pnand %p770_p7, %p764_p12 }
  0x82   : > { %774 = shalt.err (!%p771_p6)
}
  0x83   : > { %621 = dma.hbm_to_vmem [thread:$0]  (!%p978_p13), %s1069_s14, 128, %s271_s1, %s260_s21  }
  0x84   : > { %p1220_p8 = scmp.ne.s32.totalorder %s1219_s24, 0 }
  0x85   : > { %s1092_s23 = sand.u32 (!%p1220_p8), 1, %s869_s19   ;;  %p1221_p2 = scmp.ne.s32.totalorder (!%p1220_p8), %s1211_s28, 0 }
  0x86   : > { %279 = sbr.rel (%p1220_p8) target bundleno = 194 (0xc2), region = 36  ;;  %s1095_s11 = sshll.u32 (!%p1220_p8), %s1092_s23, 3 }
  0x87   : > { %s282_s12 = scalar_lea.sflag (!%p1220_p8), [#allocation3], %s1092_s23  ;;  %s285_s0 = scalar_lea.vmem (!%p1220_p8), [#allocation2], %s1095_s11 }
  0x8b   : > { %844 = dma.done.wait (%p1221_p2), %s282_s12, 128  }
  0x8c   : > { %846 = vsyncadd (%p1221_p2), %s282_s12, 4294967168  ;;  %s290_s9 = sand.u32 1, %s936_s22   ;;  %s294_s13 = scalar_lea.vmem [#allocation5], %s1095_s11 }
  0x8d   : > { %s291_s24 = scalar_lea.sflag [#allocation6], %s290_s9 }
  0x8e   : > { %848 = dma.done.wait (%p1221_p2), %s291_s24, 256  }
  0x8f   : > { %850 = vsyncadd (%p1221_p2), %s291_s24, 4294967040  ;;  %s303_s14 = scalar_lea.vmem [#allocation7], %s1095_s11  ;;  %s309_s27 = scalar_lea.sflag [#allocation9], %s1092_s23 }
  0x90   : > { %s312_s1 = scalar_lea.vmem [#allocation8], %s1095_s11 }
  0x91   : > { %852 = dma.done.wait (%p1221_p2), %s309_s27, 128  }
  0x92   : > { %854 = vsyncadd (%p1221_p2), %s309_s27, 4294967168  ;;  %s351_s21 = scalar_lea.vmem [#allocation10], %s1095_s11  ;;  %s358_s25 = scalar_lea.vmem [#allocation11], %s1095_s11  ;;  %v359_v0 = vld [vmem:[%s285_s0] sm:$0xff]  ;;  %v360_v1 = vld [vmem:[%s294_s13] sm:$0xff]  ;;  %vm364_vm0 = vcmask 261120  }
  0x93   : > { %s392_s17 = sshll.u32 %s351_s21, 4  ;;  %s405_s20 = sshll.u32 %s358_s25, 4  ;;  %v366_v2 = vld [vmem:[%s303_s14] sm:$0xff]  ;;  %vm361_vm1 = vcmp.lt.s32.totalorder %v360_v1, 0  ;;  %v362_v3 = vmul.f32 2.0, %v359_v0  ;;  %v367_v4 = vld [vmem:[%s312_s1] sm:$0xff]  ;;  %s1119_s17 = int_to_ptr.vmem [resolvable:$true] %s392_s17  ;;  %s1121_s20 = int_to_ptr.vmem [resolvable:$true] %s405_s20 }
  0x94   : > { %s593_s16 = sshll.u32 %s936_s22, 7  ;;  %v369_v5 = vmul.f32 2.0, %v366_v2  ;;  %vm371_vm2 = vcmask 97280   ;;  %vm368_vm3 = vcmp.lt.s32.totalorder %v367_v4, 0  ;;  %s374_s8 = scalar_lea.sflag [#allocation4], %s1092_s23 }
  0x95   : > { %s1126_s15 = scalar_lea.hbm %s1197_s4, %s593_s16  ;;  %v363_v6 = vsel %vm361_vm1, %v362_v3, 0.0  ;;  %s1131_s6 = scalar_lea.hbm %s1198_s5, %s593_s16 }
  0x96   : > { %v370_v7 = vsel %vm368_vm3, %v369_v5, 0.0  ;;  %365 = vst.msk [vmem:[%s351_s21] sm:$0xff] %vm364_vm0, %v363_v6  ;;  %s775_s26 = scalar_lea.vmem %s1119_s17, 128  ;;  %p1222_p10 = scmp.ne.s32.totalorder %s1212_s29, 0 }
  0x97   : > { %372 = vst.msk [vmem:[%s358_s25] sm:$0xff] %vm371_vm2, %v370_v7  ;;  %p776_p13 = scmp.ne.s32.totalorder %s1119_s17, %s775_s26  ;;  %s883_s11 = smov [#allocation10]  }
  0x98   : > { %s779_s12 = sshll.u32 %s883_s11, 4  ;;  %s780_s12 = int_to_ptr.vmem [resolvable:$false] %s779_s12 }
  0x99   : > { %p777_p1 = pnand %p776_p13, %p1222_p10  ;;  %s781_s0 = scalar_lea.vmem %s780_s12, 256 }
  0x9a   : > { %p782_p9 = scmp.lt.s32.totalorder %s1119_s17, %s780_s12  ;;  %p783_p0 = scmp.lt.s32.totalorder %s781_s0, %s775_s26 }
  0x9b   : > { %p778_p3 = pneg %p777_p1 }
  0x9c   : > { %p784_p11 = por %p783_p0, %p782_p9 }
  0x9e   : > { %p785_p12 = pnand %p784_p11, %p778_p3 }
  0xa0   : > { %788 = shalt.err (!%p785_p12)
}
  0xa1   : > { %s789_s9 = scalar_lea.hbm %s1126_s15, 128  ;;  %s793_s14 = scalar_lea.hbm %s1197_s4, 256 }
  0xa2   : > { %p790_p4 = scmp.ne.s32.totalorder %s1126_s15, %s789_s9  ;;  %p794_p6 = scmp.lt.s32.totalorder %s1126_s15, %s1197_s4 }
  0xa3   : > { %p795_p8 = scmp.lt.s32.totalorder %s793_s14, %s789_s9 }
  0xa4   : > { %p791_p5 = pnand %p790_p4, %p1222_p10 }
  0xa5   : > { %p796_p2 = por %p795_p8, %p794_p6 }
  0xa6   : > { %p792_p7 = pneg %p791_p5 }
  0xa8   : > { %p797_p13 = pnand %p796_p2, %p792_p7 }
  0xaa   : > { %800 = shalt.err (!%p797_p13)
}
  0xab   : > { %605 = dma.vmem_to_hbm [thread:$0]  (%p1222_p10), %s1119_s17, 128, %s1126_s15, %s374_s8  }
  0xac   : > { %s379_s21 = scalar_lea.sflag [#allocation12], %s1092_s23  ;;  %s801_s25 = scalar_lea.vmem %s1121_s20, 128 }
  0xad   : > { %p802_p1 = scmp.ne.s32.totalorder %s1121_s20, %s801_s25  ;;  %s884_s16 = smov [#allocation11]  }
  0xae   : > { %s805_s28 = sshll.u32 %s884_s16, 4  ;;  %s806_s28 = int_to_ptr.vmem [resolvable:$false] %s805_s28 }
  0xaf   : > { %p803_p3 = pnand %p802_p1, %p1222_p10  ;;  %s807_s22 = scalar_lea.vmem %s806_s28, 256 }
  0xb0   : > { %p808_p0 = scmp.lt.s32.totalorder %s1121_s20, %s806_s28  ;;  %p809_p11 = scmp.lt.s32.totalorder %s807_s22, %s801_s25 }
  0xb1   : > { %p804_p9 = pneg %p803_p3 }
  0xb2   : > { %p810_p12 = por %p809_p11, %p808_p0 }
  0xb4   : > { %p811_p4 = pnand %p810_p12, %p804_p9 }
  0xb6   : > { %814 = shalt.err (!%p811_p4)
}
  0xb7   : > { %s815_s17 = scalar_lea.hbm %s1131_s6, 128  ;;  %s819_s10 = scalar_lea.hbm %s1198_s5, 256 }
  0xb8   : > { %p816_p5 = scmp.ne.s32.totalorder %s1131_s6, %s815_s17  ;;  %p820_p8 = scmp.lt.s32.totalorder %s1131_s6, %s1198_s5 }
  0xb9   : > { %p821_p2 = scmp.lt.s32.totalorder %s819_s10, %s815_s17 }
  0xba   : > { %p817_p7 = pnand %p816_p5, %p1222_p10 }
  0xbb   : > { %p822_p13 = por %p821_p2, %p820_p8 }
  0xbc   : > { %p818_p6 = pneg %p817_p7 }
  0xbe   : > { %p823_p1 = pnand %p822_p13, %p818_p6 }
  0xc0   : > { %826 = shalt.err (!%p823_p1)
}
  0xc1   : > { %606 = dma.vmem_to_hbm [thread:$0]  (%p1222_p10), %s1121_s20, 128, %s1131_s6, %s379_s21  }
  0xc2 PF: > { %s1223_s26 = sld [smem:[#allocation19_spill]]  ;;  %s417_s11 = sand.u32 1, %s865_s18  }
  0xc3   : > { %p1224_p3 = scmp.ne.s32.totalorder %s1213_s30, 0  ;;  %s418_s12 = scalar_lea.sflag [#allocation4], %s417_s11 }
  0xc8   : > { %p1225_p9 = scmp.ge.s32.totalorder %s1223_s26, 2 }
  0xca   : > { %p623_p0 = pnand %p1225_p9, %p1224_p3 }
  0xcc   : > { %p624_p11 = pneg %p623_p0 }
  0xce   : > { %856 = dma.done.wait (%p624_p11), %s418_s12, 128  }
  0xcf   : > { %858 = vsyncadd (%p624_p11), %s418_s12, 4294967168  ;;  %s427_s0 = scalar_lea.sflag [#allocation12], %s417_s11 }
  0xd0   : > { %860 = dma.done.wait (%p624_p11), %s427_s0, 128  }
  0xd1   : > { %862 = vsyncadd (%p624_p11), %s427_s0, 4294967168  ;;  %s1226_s21 = sld [smem:[#allocation20_spill]]  ;;  %s1229_s18 = smov %s869_s19 }
  0xd2   : > { %s1227_s29 = sld [smem:[#allocation18_spill]] }
  0xd3   : > { %s1228_s20 = sld [smem:[#allocation21_spill]] }
  0xd7   : > { %p28_p10 = scmp.ge.s32.totalorder %s1226_s21, 4  }
  0xd8   : > { %s1230_s19 = smov %s1227_s29 }
  0xd9   :  { %30 = sbr.rel (!%p28_p10) target bundleno = 14 (0xe), region = 135 }
  0xde   :  { %432 = vsyncpa [#allocation3], 1 }
  0xdf   :  { %434 = vsyncpa [#allocation3 + $0x1], 1 }
  0xe0   :  { %435 = vsyncpa [#allocation6], 1 }
  0xe1   :  { %437 = vsyncpa [#allocation6 + $0x1], 1 }
  0xe2   :  { %438 = vsyncpa [#allocation9], 1 }
  0xe3   :  { %440 = vsyncpa [#allocation9 + $0x1], 1 }
  0xe4   :  { %441 = vsyncpa [#allocation4], 1 }
  0xe5   :  { %443 = vsyncpa [#allocation4 + $0x1], 1 }
  0xe6   :  { %444 = vsyncpa [#allocation12], 1 }
  0xe7   :  { %446 = vsyncpa [#allocation12 + $0x1], 1 }

</bundles_post_ra>
